<compile_context>
chip_gen: v6e
topology: v6e:2x2x1
jax: 0.10.0
libtpu: 0.0.40
codegen_flags: <defaults>
</compile_context>

<pallas_src>
import functools

import jax
import jax.numpy as jnp
from jax.experimental import pallas as pl
from jax.experimental.pallas import tpu as pltpu


def _round_up(x, m):
    return (x + m - 1) // m * m


def _nconv_kernel(at_ref, x_ref, o_ref, *, precision):
    # at_ref: (R, V)   A^T (row-padded), resident across all grid steps
    # x_ref:  (V, tn)  one lane tile of the folded (V, N*C*L) input
    # o_ref:  (R, tn)  lane-dense output tile
    o_ref[...] = jnp.dot(
        at_ref[...],
        x_ref[...],
        preferred_element_type=jnp.float32,
        precision=precision,
    ).astype(o_ref.dtype)


def _nconv_rows(at, xt, *, lane_tile, precision, out_dtype):
    """Core call: at (R, V) @ xt (V, M) -> (R, M). R is already a multiple of 8."""
    R, V = at.shape
    Vx, M = xt.shape
    assert V == Vx, "A row dim must match node dim of x"

    if M <= lane_tile:
        tn = M                                     # single tile; full-dim block is legal
    else:
        tn = max(128, (lane_tile // 128) * 128)    # lane tiles must be 128-aligned
    grid = pl.cdiv(M, tn)                          # last tile may be ragged (masked writes)

    itemsize = jnp.dtype(xt.dtype).itemsize
    # double-buffered x/out tiles + (small) resident A^T, plus headroom
    need = 2 * (V * tn + R * tn + R * V) * itemsize
    vmem_limit = int(min(max(need + (8 << 20), 32 << 20), 64 << 20))

    return pl.pallas_call(
        functools.partial(_nconv_kernel, precision=precision),
        out_shape=jax.ShapeDtypeStruct((R, M), out_dtype),
        grid_spec=pltpu.PrefetchScalarGridSpec(
            num_scalar_prefetch=0,
            grid=(grid,),
            in_specs=[
                # A^T: small, constant index_map -> fetched once, stays resident.
                pl.BlockSpec((R, V), lambda j: (0, 0)),
                # One lane tile of the folded input per grid step.
                pl.BlockSpec((V, tn), lambda j: (0, j)),
            ],
            out_specs=pl.BlockSpec((R, tn), lambda j: (0, j)),
        ),
        compiler_params=pltpu.CompilerParams(
            dimension_semantics=("parallel",),
            vmem_limit_bytes=vmem_limit,
        ),
        cost_estimate=pl.CostEstimate(
            flops=2 * R * V * M,
            transcendentals=0,
            bytes_accessed=(V * M + R * M + R * V) * itemsize,
        ),
    )(at, xt)


def nconv_folded(xt, A, *, lane_tile=4096,
                 precision=jax.lax.Precision.HIGHEST, out_dtype=None):
    """Folded-layout nconv: xt (V, M), A (V, W) -> (W, M).

    Keep this layout across GraphWaveNet's diffusion chain to avoid one
    transpose pass over the full tensor per hop.
    """
    V, M = xt.shape
    Va, W = A.shape
    assert Va == V, "A first dim must match node dim of x"
    at = A.T                                        # hoisted out of the kernel, tiny
    W_pad = _round_up(W, 8)
    if W_pad != W:
        at = jnp.pad(at, ((0, W_pad - W), (0, 0)))  # pad only the small operand
    out = _nconv_rows(at, xt, lane_tile=lane_tile, precision=precision,
                      out_dtype=out_dtype or xt.dtype)
    return out[:W] if W_pad != W else out


def nconv(x, A, *, lane_tile=4096, precision=jax.lax.Precision.HIGHEST):
    """PyTorch-compatible nconv: x (N, C, V, L), A (V, W) -> (N, C, W, L)."""
    N, C, V, L = x.shape
    W = A.shape[1]
    xt = jnp.transpose(x, (2, 0, 1, 3)).reshape(V, N * C * L)     # one HBM copy
    out = nconv_folded(xt, A, lane_tile=lane_tile, precision=precision,
                       out_dtype=x.dtype)                          # (W, M)
    return jnp.transpose(out.reshape(W, N, C, L), (1, 2, 0, 3))    # one HBM copy


def nconv_supports(x, supports, *, lane_tile=4096,
                   precision=jax.lax.Precision.HIGHEST):
    """Fused nconv against several adjacencies: x is read from HBM once.

    x: (N, C, V, L); supports: sequence of (V, W_s) matrices.
    Returns [nconv(x, A_s) for A_s in supports] via a single pallas_call.
    """
    N, C, V, L = x.shape
    M = N * C * L
    xt = jnp.transpose(x, (2, 0, 1, 3)).reshape(V, M)
    ats, row_info = [], []
    for A in supports:
        Va, W = A.shape
        assert Va == V, "support first dim must match node dim of x"
        W_pad = _round_up(W, 8)
        at = A.T
        if W_pad != W:
            at = jnp.pad(at, ((0, W_pad - W), (0, 0)))
        ats.append(at)
        row_info.append((W, W_pad))
    at_stack = jnp.concatenate(ats, axis=0)                        # (sum W_pad, V)
    out = _nconv_rows(at_stack, xt, lane_tile=lane_tile, precision=precision,
                      out_dtype=x.dtype)                           # (sum W_pad, M)
    results, off = [], 0
    for W, W_pad in row_info:
        o = out[off:off + W].reshape(W, N, C, L)
        results.append(jnp.transpose(o, (1, 2, 0, 3)))
        off += W_pad
    return results


if __name__ == "__main__":
    key = jax.random.PRNGKey(0)
    kx, ka, ka2 = jax.random.split(key, 3)
    hi = jax.lax.Precision.HIGHEST

    # Small shapes consistent with GraphWaveNet's nconv:
    #   batch N=2, channels C=4, nodes V=16, time L=8, square adjacency.
    N, C, V, L = 2, 4, 16, 8
    W = V
    x = jax.random.normal(kx, (N, C, V, L), dtype=jnp.float32)
    A = jax.random.normal(ka, (V, W), dtype=jnp.float32)

    out = jax.block_until_ready(nconv(x, A))
    ref = jnp.einsum("ncvl,vw->ncwl", x, A, precision=hi)
    assert out.shape == (N, C, W, L)
    assert jnp.allclose(out, ref, atol=1e-5, rtol=1e-5)

    # Ragged-path test: V not a multiple of 8 and M not a multiple of the lane
    # tile -> multi-step grid with a masked (ragged) last output tile.
    N2, C2, V2, L2 = 2, 5, 13, 30          # M = 300; lane_tile=256 -> grid of 2
    x2 = jax.random.normal(kx, (N2, C2, V2, L2), dtype=jnp.float32)
    A2 = jax.random.normal(ka2, (V2, V2), dtype=jnp.float32)
    out2 = jax.block_until_ready(nconv(x2, A2, lane_tile=256))
    ref2 = jnp.einsum("ncvl,vw->ncwl", x2, A2, precision=hi)
    assert jnp.allclose(out2, ref2, atol=1e-5, rtol=1e-5)

    # Fused multi-support path (forward + backward diffusion supports):
    # x is read from HBM once for both adjacencies.
    outs = jax.block_until_ready(nconv_supports(x, [A, A.T]))
    for o, a in zip(outs, [A, A.T]):
        r = jnp.einsum("ncvl,vw->ncwl", x, a, precision=hi)
        assert jnp.allclose(o, r, atol=1e-5, rtol=1e-5)

    print("KERNEL_OK")
</pallas_src>

<mosaic_0001>
module attributes {stable_mosaic.version = 11 : i64} {
  func.func @_nconv_kernel(%arg0: i32, %arg1: memref<16x16xf32, #tpu.memory_space<vmem>>, %arg2: memref<16x64xf32, #tpu.memory_space<vmem>>, %arg3: memref<16x64xf32, #tpu.memory_space<vmem>>) attributes {dimension_semantics = [#tpu.dimension_semantics<parallel>], iteration_bounds = array<i64: 1>, scalar_prefetch = 0 : i64, scratch_operands = 0 : i64, tpu.core_type = #tpu.core_type<tc>, window_params = [{pipeline_mode = #tpu.pipeline_mode<synchronous>, transform_indices = @transform_0, window_bounds = array<i64: 16, 16>}, {transform_indices = @transform_1, window_bounds = array<i64: 16, 64>}, {transform_indices = @transform_2, window_bounds = array<i64: 16, 64>}]} {
    %c0 = arith.constant 0 : index
    %c0_0 = arith.constant 0 : index
    %0 = vector.load %arg1[%c0, %c0_0] : memref<16x16xf32, #tpu.memory_space<vmem>>, vector<16x16xf32>
    %c0_1 = arith.constant 0 : index
    %c0_2 = arith.constant 0 : index
    %1 = vector.load %arg2[%c0_1, %c0_2] : memref<16x64xf32, #tpu.memory_space<vmem>>, vector<16x64xf32>
    %cst = arith.constant dense<0.000000e+00> : vector<16x64xf32>
    %2 = tpu.matmul %0, %1, %cst {dimension_numbers = #tpu.dot_dimension_numbers<[1], [0], [0], [1], [0, 0, 1, 1], [], []>, precision = #tpu.contract_precision<fp32>} : vector<16x16xf32>, vector<16x64xf32>, vector<16x64xf32> -> vector<16x64xf32>
    %c0_3 = arith.constant 0 : index
    %c0_4 = arith.constant 0 : index
    %3 = vector.load %arg3[%c0_3, %c0_4] : memref<16x64xf32, #tpu.memory_space<vmem>>, vector<16x64xf32>
    tpu.vector_store %arg3[%c0_3, %c0_4], %2 {strides = array<i32>} : memref<16x64xf32, #tpu.memory_space<vmem>>, vector<16x64xf32>,
    return
  }
  func.func @transform_0(%arg0: i32) -> (i32, i32) {
    %c0_i32 = arith.constant 0 : i32
    %c0_i32_0 = arith.constant 0 : i32
    %c0_i32_1 = arith.constant 0 : i32
    return %c0_i32, %c0_i32_0 : i32, i32
  }
  func.func @transform_1(%arg0: i32) -> (i32, i32) {
    %c0_i32 = arith.constant 0 : i32
    %c0_i32_0 = arith.constant 0 : i32
    return %c0_i32, %arg0 : i32, i32
  }
  func.func @transform_2(%arg0: i32) -> (i32, i32) {
    %c0_i32 = arith.constant 0 : i32
    %c0_i32_0 = arith.constant 0 : i32
    return %c0_i32, %arg0 : i32, i32
  }
}

</mosaic_0001>

<bundles_post_ra>
// kernel: tpu_custom_call.1
= control target key start
LH: loop header
LB: loop body
LE: loop exit
PB: predicated region body
PF: predicated region fallthrough
CT: control target
= control target key end

     0   :  { %7 = vsyncpa [#allocation3], 0  ;;  %s749_s0 = inlined_call_operand.hbm [shape: f32[16,16], index: 0, kind: input, shape index: {}]   ;;  %s750_s1 = inlined_call_operand.hbm [shape: f32[16,64], index: 1, kind: input, shape index: {}]   ;;  %s751_s2 = inlined_call_operand.hbm [shape: f32[16,64], index: 2, kind: output, shape index: {}]  }
   0x1   :  { %8 = vsyncpa [#allocation6], 0 }
   0x2   :  { %9 = vsyncpa [#allocation4], 0  ;;  %s711_s9 = smov [#allocation2]  }
   0x3   :  { %s15_s10 = sshll.u32 %s711_s9, 4  ;;  %s16_s10 = int_to_ptr.vmem [resolvable:$true] %s15_s10 }
   0x4   :  { %s653_s11 = scalar_lea.vmem %s16_s10, 256  ;;  %p658_p1 = scmp.lt.s32.totalorder %s16_s10, %s16_s10 }
   0x5   :  { %p654_p0 = scmp.ne.s32.totalorder %s16_s10, %s653_s11  ;;  %p659_p2 = scmp.lt.s32.totalorder %s653_s11, %s653_s11 }
   0x7   :  { %p660_p3 = por %p659_p2, %p658_p1 }
   0x9   :  { %p661_p4 = pnand %p660_p3, %p654_p0 }
   0xb   :  { %664 = shalt.err (!%p661_p4)
}
   0xc   :  { %s712_s12 = smov 128   ;;  %s713_s13 = smov 8  }
   0xd   :  { %21 = dma.hbm_to_vmem [thread:$0]  %s749_s0, 256, %s16_s10, [#allocation3], %s712_s12, %s712_s12, %s713_s13  }
   0xe   :  { %s714_s16 = smov [#allocation5]  }
   0xf   :  { %s27_s17 = sshll.u32 %s714_s16, 4  ;;  %s28_s17 = int_to_ptr.vmem [resolvable:$true] %s27_s17 }
  0x10   :  { %s673_s18 = scalar_lea.vmem %s28_s17, 256  ;;  %p678_p6 = scmp.lt.s32.totalorder %s28_s17, %s28_s17 }
  0x11   :  { %p674_p5 = scmp.ne.s32.totalorder %s28_s17, %s673_s18  ;;  %p679_p7 = scmp.lt.s32.totalorder %s673_s18, %s673_s18 }
  0x13   :  { %p680_p8 = por %p679_p7, %p678_p6 }
  0x15   :  { %p681_p9 = pnand %p680_p8, %p674_p5 }
  0x17   :  { %684 = shalt.err (!%p681_p9)
}
  0x18   :  { %33 = dma.hbm_to_vmem [thread:$0]  %s750_s1, 256, %s28_s17, [#allocation6], %s712_s12, %s712_s12, %s713_s13  }
  0x19   :  { %705 = dma.done.wait [#allocation3], 256  }
  0x1a   :  { %706 = vsyncadd [#allocation3], 4294967040 }
  0x1b   :  { %707 = dma.done.wait [#allocation6], 256  }
  0x1c   :  { %708 = vsyncadd [#allocation6], 4294967040  ;;  %vm44_vm0 = vcmask 130048   ;;  %v43_v0 = vld [vmem:[#allocation5 + $0x8] sm:$0xff]  ;;  %v42_v1 = vld [vmem:[#allocation5] sm:$0xff]  ;;  %vm553_vm1 = vcmask 523264  }
  0x1d   :  { %v40_v2 = vld [vmem:[#allocation2] sm:$0xff]  ;;  %v80_v3 = vand.u32 4294901760, %v43_v0  ;;  %v83_v4 = vand.u32 4294901760, %v42_v1  ;;  %v41_v5 = vld [vmem:[#allocation2 + $0x8] sm:$0xff]  ;;  %s715_s0 = smov [#allocation7]  }
  0x1e   :  { %v46_v6 = vsel %vm44_vm0, %v40_v2, 0  ;;  %v49_v7 = vsel %vm44_vm0, %v41_v5, 0  ;;  %s561_s1 = sshll.u32 %s715_s0, 4  ;;  %s562_s1 = int_to_ptr.vmem [resolvable:$true] %s561_s1 }
  0x1f   :  { %v118_v8 = vand.u32 4294901760, %v46_v6  ;;  %598 = vmatprep.subr.mxu0 %v80_v3  ;;  %v168_v9 = vsub.f32 %v43_v0, %v80_v3  ;;  %v128_v10 = vand.u32 4294901760, %v49_v7  ;;  %v175_v11 = vsub.f32 %v42_v1, %v83_v4  ;;  %s685_s21 = scalar_lea.vmem %s562_s1, 256  ;;  %p690_p11 = scmp.lt.s32.totalorder %s562_s1, %s562_s1 }
  0x20   :  { %599 = vmatpush3.msra.mxu0 %v80_v3  ;;  %p686_p10 = scmp.ne.s32.totalorder %s562_s1, %s685_s21  ;;  %p691_p12 = scmp.lt.s32.totalorder %s685_s21, %s685_s21 }
  0x21   :  { %v119_v12 = vsub.f32 %v46_v6, %v118_v8  ;;  %609 = vmatprep.mubr.f32.mxu1 %v118_v8  ;;  %600 = vmatprep.subr.mxu0 %v83_v4  ;;  %v169_v13 = vand.u32 4294901760, %v168_v9  ;;  %v129_v14 = vsub.f32 %v49_v7, %v128_v10  ;;  %v176_v15 = vand.u32 4294901760, %v175_v11 }
  0x22   :  { %601 = vmatpush3.msra.mxu0 %v83_v4  ;;  %p692_p13 = por %p691_p12, %p690_p11 }
  0x23   :  { %v120_v16 = vand.u32 4294901760, %v119_v12  ;;  %v170_v17 = vsub.f32 %v168_v9, %v169_v13  ;;  %v130_v18 = vand.u32 4294901760, %v129_v14  ;;  %v177_v19 = vsub.f32 %v175_v11, %v176_v15  ;;  %612 = vmatprep.subr.mxu0 %v168_v9 }
  0x24   :  { %p693_p0 = pnand %p692_p13, %p686_p10 }
  0x25   :  { %v121_v20 = vsub.f32 %v119_v12, %v120_v16  ;;  %v171_v21 = vand.u32 4294901760, %v170_v17  ;;  %v131_v22 = vsub.f32 %v129_v14, %v130_v18  ;;  %v178_v23 = vand.u32 4294901760, %v177_v19 }
  0x27   :  { %v122_v24 = vand.u32 4294901760, %v121_v20  ;;  %605 = vmatprep.subr.mxu1 %v171_v21  ;;  %v132_v25 = vand.u32 4294901760, %v131_v22 }
  0x28   :  { %606 = vmatpush3.msra.mxu1 %v171_v21 }
  0x29   :  { %602 = vmatprep.mubr.f32.mxu0 %v122_v24  ;;  %607 = vmatprep.subr.mxu1 %v178_v23 }
  0x2a   :  { %603 = vmatmul.mubr.f32.vlgmr.msra.gmra.mxu0 %v132_v25  ;;  %608 = vmatpush3.msra.mxu1 %v178_v23 }
  0x2b   :  { %613 = vmatpush3.msra.mxu0 %v168_v9  ;;  %610 = vmatmul.mubr.f32.vlgmr.msra.gmra.mxu1 %v128_v10 }
  0x2c   :  { %614 = vmatprep.subr.mxu0 %v175_v11  ;;  %619 = vmatprep.subr.mxu1 %v80_v3 }
  0x2d   :  { %615 = vmatpush3.msra.mxu0 %v175_v11  ;;  %616 = vmatprep.mubr.f32.mxu0 %v119_v12 }
  0x2e   :  { %620 = vmatpush3.msra.mxu1 %v80_v3  ;;  %617 = vmatmul.mubr.f32.vlgmr.msra.gmra.mxu0 %v129_v14 }
  0x2f   :  { %621 = vmatprep.subr.mxu1 %v83_v4  ;;  %626 = vmatprep.subr.mxu0 %v169_v13 }
  0x30   :  { %622 = vmatpush3.msra.mxu1 %v83_v4  ;;  %623 = vmatprep.mubr.f32.mxu1 %v120_v16 }
  0x31   :  { %627 = vmatpush3.msra.mxu0 %v169_v13  ;;  %624 = vmatmul.mubr.f32.vlgmr.msra.gmra.mxu1 %v130_v18 }
  0x32   :  { %628 = vmatprep.subr.mxu0 %v176_v15  ;;  %633 = vmatprep.subr.mxu1 %v80_v3 }
  0x33   :  { %629 = vmatpush3.msra.mxu0 %v176_v15  ;;  %630 = vmatprep.mubr.f32.mxu0 %v118_v8 }
  0x34   :  { %634 = vmatpush3.msra.mxu1 %v80_v3  ;;  %631 = vmatmul.mubr.f32.vlgmr.msra.gmra.mxu0 %v128_v10 }
  0x35   :  { %635 = vmatprep.subr.mxu1 %v83_v4  ;;  %637 = vmatprep.mubr.f32.mxu1 %v118_v8 }
  0x36   :  { %636 = vmatpush3.msra.mxu1 %v83_v4 }
  0x37   :  { %638 = vmatmul.mubr.f32.vlgmr.msra.gmra.mxu1 %v128_v10 }
  0xea   :  { %v604_v26 = vpop.f32.mrf.mxu0 }
  0xeb   :  { %v611_v28 = vpop.f32.mrf.mxu1 }
  0xec   :  { %v124_v27 = vpop.f32.mrf.mxu0  ;;  %v222_v29 = vadd.f32 %v611_v28, %v604_v26 }
  0xed   :  { %v215_v30 = vpop.f32.mrf.mxu1 }
  0xee   :  { %v216_v31 = vadd.f32 %v215_v30, %v124_v27  ;;  %v618_v32 = vpop.f32.mrf.mxu0 }
  0xef   :  { %v305_v33 = vadd.f32 %v618_v32, %v222_v29 }
  0xf0   :  { %v297_v34 = vpop.f32.mrf.mxu0 }
  0xf1   :  { %v298_v35 = vadd.f32 %v297_v34, %v216_v31  ;;  %v625_v36 = vpop.f32.mrf.mxu1 }
  0xf2   :  { %v388_v37 = vadd.f32 %v625_v36, %v305_v33 }
  0xf3   :  { %v379_v38 = vpop.f32.mrf.mxu1 }
  0xf4   :  { %v380_v39 = vadd.f32 %v379_v38, %v298_v35  ;;  %v632_v40 = vpop.f32.mrf.mxu0 }
  0xf5   :  { %v471_v41 = vadd.f32 %v632_v40, %v388_v37 }
  0xf6   :  { %v464_v42 = vpop.f32.mrf.mxu0 }
  0xf7   :  { %v639_v43 = vpop.f32.mrf.mxu1  ;;  %v465_v44 = vadd.f32 %v464_v42, %v380_v39 }
  0xf8   :  { %v550_v45 = vadd.f32 %v639_v43, %v471_v41 }
  0xf9   :  { %v543_v46 = vpop.f32.mrf.mxu1 }
  0xfa   :  { %v544_v47 = vadd.f32 %v543_v46, %v465_v44  ;;  %555 = vst.msk [vmem:[#allocation7 + $0x8] sm:$0xff] %vm553_vm1, %v550_v45 }
  0xfc   :  { %554 = vst.msk [vmem:[#allocation7] sm:$0xff] %vm553_vm1, %v544_v47 }
  0xfd   :  { %696 = shalt.err (!%p693_p0)
}
  0xfe   :  { %567 = dma.vmem_to_hbm [thread:$0]  %s562_s1, 256, %s751_s2, [#allocation4], %s712_s12, %s712_s12, %s713_s13  }
  0xff   :  { %709 = dma.done.wait [#allocation4], 256  }
 0x100   :  { %710 = vsyncadd [#allocation4], 4294967040 }
 0x101   :  { %571 = vsyncpa [#allocation3], 1 }
 0x102   :  { %572 = vsyncpa [#allocation6], 1 }
 0x103   :  { %573 = vsyncpa [#allocation4], 1 }

</bundles_post_ra>
